<compile_context>
chip_gen: v7x
topology: tpu7x:2x2x1
jax: 0.10.0
libtpu: 0.0.40
codegen_flags: <defaults>
</compile_context>

<pallas_src>
import functools
import math

import jax
import jax.numpy as jnp
from jax.experimental import pallas as pl
from jax.experimental.pallas import tpu as pltpu


def _addnorm_kernel(x_ref, y_ref, gamma_ref, beta_ref, o_ref, *, eps: float):
    # x_ref / y_ref / o_ref: (block_rows, H) VMEM tiles in the I/O dtype
    # gamma_ref / beta_ref:  (1, H), resident, broadcast over rows (sublanes)
    z = y_ref[...].astype(jnp.float32) + x_ref[...].astype(jnp.float32)
    h = z.shape[-1]

    # Single-pass statistics: both reductions are independent XLU ops, no
    # full-tile `centered` temporary.  All accumulation is in f32.
    inv_h = 1.0 / h
    s1 = jnp.sum(z, axis=-1, keepdims=True)
    s2 = jnp.sum(z * z, axis=-1, keepdims=True)
    mean = s1 * inv_h
    var = jnp.maximum(s2 * inv_h - mean * mean, 0.0)
    inv = jax.lax.rsqrt(var + eps)            # EUP rsqrt — off the VALU path

    out = (z - mean) * inv * gamma_ref[...].astype(jnp.float32) \
        + beta_ref[...].astype(jnp.float32)
    o_ref[...] = out.astype(o_ref.dtype)


def _pick_block_rows(R: int, H: int, itemsize: int,
                     vmem_budget_bytes: int) -> int:
    """VMEM-aware row tile, rounded to the sublane tile for the I/O dtype."""
    sublane = max(8, 32 // itemsize)          # 8 for f32, 16 for bf16

    # Bytes per row flowing through the pipeline:
    #   (2 inputs + 1 output) x 2 double-buffers in the I/O dtype
    #   + ~2 f32 intermediates (z, reduction temps) inside the body.
    bytes_per_row = 6 * H * itemsize + 2 * H * 4
    br = max(1, vmem_budget_bytes // bytes_per_row)
    br = min(br, 1024)                        # ~512-1024 rows is the sweet spot
    br = max(sublane, (br // sublane) * sublane)

    total_io_bytes = 3 * R * H * itemsize
    if total_io_bytes <= (256 << 10):
        # Genuinely tiny: whole problem is resident; a single grid step avoids
        # pointless per-step prologue/epilogue.  block_rows == full array dim,
        # so the (8,128) tiling constraint is satisfied even for odd R.
        return R

    # Otherwise keep >=2 grid steps so BlockSpec double-buffering pipelines
    # HBM reads / compute / writeback and v7x's two TCs both get work.
    half_rows = pl.cdiv(R, 2)
    half_rows = max(sublane, pl.cdiv(half_rows, sublane) * sublane)
    return min(br, half_rows)


def add_norm(X, Y, gamma, beta, *, eps: float = 1e-5,
             block_rows: int | None = None,
             vmem_budget_bytes: int = 24 << 20):
    """X, Y: (..., H) with identical shapes; gamma/beta: (H,)."""
    assert X.shape == Y.shape
    orig_shape = X.shape
    H = orig_shape[-1]
    R = math.prod(orig_shape[:-1])
    itemsize = jnp.dtype(X.dtype).itemsize

    x2 = X.reshape(R, H)
    y2 = Y.reshape(R, H)
    g2 = gamma.reshape(1, H)
    b2 = beta.reshape(1, H)

    if block_rows is None:
        block_rows = _pick_block_rows(R, H, itemsize, vmem_budget_bytes)

    # Ragged row counts: pad the last block with zeros (LayerNorm of a zero
    # row is finite thanks to eps), slice the padding off afterwards.
    num_blocks = pl.cdiv(R, block_rows)
    R_pad = num_blocks * block_rows
    if R_pad != R:
        pad = R_pad - R
        x2 = jnp.pad(x2, ((0, pad), (0, 0)))
        y2 = jnp.pad(y2, ((0, pad), (0, 0)))

    # Scoped-VMEM limit: large enough for the double-buffered tiles plus f32
    # intermediates on every chip's default (16/32/32 MiB), capped well under
    # v7x's 64 MiB physical VMEM.
    est_vmem = 6 * block_rows * H * itemsize + 4 * block_rows * H * 4 + (64 << 10)
    vmem_limit = int(min(max(est_vmem, 32 << 20), 48 << 20))

    out = pl.pallas_call(
        functools.partial(_addnorm_kernel, eps=eps),
        out_shape=jax.ShapeDtypeStruct((R_pad, H), X.dtype),
        grid_spec=pltpu.PrefetchScalarGridSpec(
            num_scalar_prefetch=0,
            grid=(num_blocks,),
            in_specs=[
                pl.BlockSpec((block_rows, H), lambda i: (i, 0)),
                pl.BlockSpec((block_rows, H), lambda i: (i, 0)),
                pl.BlockSpec((1, H), lambda i: (0, 0)),
                pl.BlockSpec((1, H), lambda i: (0, 0)),
            ],
            out_specs=pl.BlockSpec((block_rows, H), lambda i: (i, 0)),
        ),
        compiler_params=pltpu.CompilerParams(
            dimension_semantics=("parallel",),
            vmem_limit_bytes=vmem_limit,
        ),
    )(x2, y2, g2, b2)

    if R_pad != R:
        out = out[:R]
    return out.reshape(orig_shape)


def _reference(X, Y, gamma, beta, eps: float = 1e-5):
    """Pure-JAX mirror of AddNorm.forward in eval mode (dropout=identity)."""
    z = X + Y
    mean = jnp.mean(z, axis=-1, keepdims=True)
    var = jnp.mean((z - mean) ** 2, axis=-1, keepdims=True)
    return (z - mean) / jnp.sqrt(var + eps) * gamma + beta


if __name__ == "__main__":
    # Small shapes consistent with the transformer usage of AddNorm.
    batch = 2
    seq = 8
    num_hiddens = 32

    key = jax.random.PRNGKey(0)
    kx, ky, kg, kb = jax.random.split(key, 4)

    X = jax.random.normal(kx, (batch, seq, num_hiddens), dtype=jnp.float32)
    Y = jax.random.normal(ky, (batch, seq, num_hiddens), dtype=jnp.float32)

    # LayerNorm affine params (randomized to exercise the scale/shift path;
    # a freshly-constructed module would have gamma=1, beta=0).
    gamma = 1.0 + 0.1 * jax.random.normal(kg, (num_hiddens,), dtype=jnp.float32)
    beta = 0.1 * jax.random.normal(kb, (num_hiddens,), dtype=jnp.float32)

    out = add_norm(X, Y, gamma, beta)
    out = jax.block_until_ready(out)

    ref = _reference(X, Y, gamma, beta)
    assert out.shape == (batch, seq, num_hiddens)
    assert jnp.allclose(out, ref, atol=1e-5, rtol=1e-5), "mismatch vs reference"

    print("KERNEL_OK")
</pallas_src>

<mosaic_0001>
module attributes {stable_mosaic.version = 11 : i64} {
  func.func @_addnorm_kernel(%arg0: i32, %arg1: memref<16x32xf32, #tpu.memory_space<vmem>>, %arg2: memref<16x32xf32, #tpu.memory_space<vmem>>, %arg3: memref<1x32xf32, #tpu.memory_space<vmem>>, %arg4: memref<1x32xf32, #tpu.memory_space<vmem>>, %arg5: memref<16x32xf32, #tpu.memory_space<vmem>>) attributes {dimension_semantics = [#tpu.dimension_semantics<parallel>], iteration_bounds = array<i64: 1>, scalar_prefetch = 0 : i64, scratch_operands = 0 : i64, tpu.core_type = #tpu.core_type<tc>, window_params = [{transform_indices = @transform_0, window_bounds = array<i64: 16, 32>}, {transform_indices = @transform_1, window_bounds = array<i64: 16, 32>}, {pipeline_mode = #tpu.pipeline_mode<synchronous>, transform_indices = @transform_2, window_bounds = array<i64: 1, 32>}, {pipeline_mode = #tpu.pipeline_mode<synchronous>, transform_indices = @transform_3, window_bounds = array<i64: 1, 32>}, {transform_indices = @transform_4, window_bounds = array<i64: 16, 32>}]} {
    %c0 = arith.constant 0 : index
    %c0_0 = arith.constant 0 : index
    %0 = vector.load %arg2[%c0, %c0_0] : memref<16x32xf32, #tpu.memory_space<vmem>>, vector<16x32xf32>
    %c0_1 = arith.constant 0 : index
    %c0_2 = arith.constant 0 : index
    %1 = vector.load %arg1[%c0_1, %c0_2] : memref<16x32xf32, #tpu.memory_space<vmem>>, vector<16x32xf32>
    %2 = arith.addf %0, %1 : vector<16x32xf32>
    %cst = arith.constant dense<0.000000e+00> : vector<16xf32>
    %3 = vector.multi_reduction <add>, %2, %cst [1] : vector<16x32xf32> to vector<16xf32>
    %4 = vector.shape_cast %3 : vector<16xf32> to vector<16x1xf32>
    %5 = arith.mulf %2, %2 : vector<16x32xf32>
    %cst_3 = arith.constant dense<0.000000e+00> : vector<16xf32>
    %6 = vector.multi_reduction <add>, %5, %cst_3 [1] : vector<16x32xf32> to vector<16xf32>
    %7 = vector.shape_cast %6 : vector<16xf32> to vector<16x1xf32>
    %cst_4 = arith.constant 3.125000e-02 : f32
    %8 = vector.broadcast %cst_4 : f32 to vector<16x1xf32>
    %9 = arith.mulf %4, %8 : vector<16x1xf32>
    %cst_5 = arith.constant 3.125000e-02 : f32
    %10 = vector.broadcast %cst_5 : f32 to vector<16x1xf32>
    %11 = arith.mulf %7, %10 : vector<16x1xf32>
    %12 = arith.mulf %9, %9 : vector<16x1xf32>
    %13 = arith.subf %11, %12 : vector<16x1xf32>
    %cst_6 = arith.constant 0.000000e+00 : f32
    %14 = vector.broadcast %cst_6 : f32 to vector<16x1xf32>
    %15 = arith.maximumf %13, %14 : vector<16x1xf32>
    %cst_7 = arith.constant 9.99999974E-6 : f32
    %16 = vector.broadcast %cst_7 : f32 to vector<16x1xf32>
    %17 = arith.addf %15, %16 : vector<16x1xf32>
    %18 = math.rsqrt %17 : vector<16x1xf32>
    %19 = vector.broadcast %9 : vector<16x1xf32> to vector<16x32xf32>
    %20 = arith.subf %2, %19 : vector<16x32xf32>
    %21 = vector.broadcast %18 : vector<16x1xf32> to vector<16x32xf32>
    %22 = arith.mulf %20, %21 : vector<16x32xf32>
    %c0_8 = arith.constant 0 : index
    %c0_9 = arith.constant 0 : index
    %23 = vector.load %arg3[%c0_8, %c0_9] : memref<1x32xf32, #tpu.memory_space<vmem>>, vector<1x32xf32>
    %24 = vector.broadcast %23 : vector<1x32xf32> to vector<16x32xf32>
    %25 = arith.mulf %22, %24 : vector<16x32xf32>
    %c0_10 = arith.constant 0 : index
    %c0_11 = arith.constant 0 : index
    %26 = vector.load %arg4[%c0_10, %c0_11] : memref<1x32xf32, #tpu.memory_space<vmem>>, vector<1x32xf32>
    %27 = vector.broadcast %26 : vector<1x32xf32> to vector<16x32xf32>
    %28 = arith.addf %25, %27 : vector<16x32xf32>
    %c0_12 = arith.constant 0 : index
    %c0_13 = arith.constant 0 : index
    %29 = vector.load %arg5[%c0_12, %c0_13] : memref<16x32xf32, #tpu.memory_space<vmem>>, vector<16x32xf32>
    tpu.vector_store %arg5[%c0_12, %c0_13], %28 {strides = array<i32>} : memref<16x32xf32, #tpu.memory_space<vmem>>, vector<16x32xf32>,
    return
  }
  func.func @transform_0(%arg0: i32) -> (i32, i32) {
    %c0_i32 = arith.constant 0 : i32
    %c0_i32_0 = arith.constant 0 : i32
    return %arg0, %c0_i32 : i32, i32
  }
  func.func @transform_1(%arg0: i32) -> (i32, i32) {
    %c0_i32 = arith.constant 0 : i32
    %c0_i32_0 = arith.constant 0 : i32
    return %arg0, %c0_i32 : i32, i32
  }
  func.func @transform_2(%arg0: i32) -> (i32, i32) {
    %c0_i32 = arith.constant 0 : i32
    %c0_i32_0 = arith.constant 0 : i32
    %c0_i32_1 = arith.constant 0 : i32
    return %c0_i32, %c0_i32_0 : i32, i32
  }
  func.func @transform_3(%arg0: i32) -> (i32, i32) {
    %c0_i32 = arith.constant 0 : i32
    %c0_i32_0 = arith.constant 0 : i32
    %c0_i32_1 = arith.constant 0 : i32
    return %c0_i32, %c0_i32_0 : i32, i32
  }
  func.func @transform_4(%arg0: i32) -> (i32, i32) {
    %c0_i32 = arith.constant 0 : i32
    %c0_i32_0 = arith.constant 0 : i32
    return %arg0, %c0_i32 : i32, i32
  }
}

</mosaic_0001>

<bundles_post_ra>
// kernel: tpu_custom_call.1
= control target key start
LH: loop header
LB: loop body
LE: loop exit
PB: predicated region body
PF: predicated region fallthrough
CT: control target
= control target key end

     0   :  { %9 = vsyncpa [#allocation3], 0  ;;  %s293_s0 = inlined_call_operand.hbm [shape: f32[16,32], index: 0, kind: input, shape index: {}]   ;;  %s294_s1 = inlined_call_operand.hbm [shape: f32[16,32], index: 1, kind: input, shape index: {}]   ;;  %s295_s2 = inlined_call_operand.vmem [shape: f32[1,32], index: 2, kind: input, shape index: {}]   ;;  %s296_s3 = inlined_call_operand.vmem [shape: f32[1,32], index: 3, kind: input, shape index: {}]   ;;  %s297_s4 = inlined_call_operand.hbm [shape: f32[16,32], index: 4, kind: output, shape index: {}]  }
   0x1   :  { %10 = vsyncpa [#allocation6], 0 }
   0x2   :  { %11 = vsyncpa [#allocation4], 0  ;;  %s206_s15 = smov [#allocation2]   ;;  %s134_s19 = scalar_lea.hbm %s293_s0, 256 }
   0x3   :  { %s17_s16 = sshll.u32 %s206_s15, 4  ;;  %p135_p0 = scmp.ne.s32.totalorder %s293_s0, %s134_s19  ;;  %s18_s16 = int_to_ptr.vmem [resolvable:$true] %s17_s16 }
   0x4   :  { %p138_p1 = scmp.lt.u32.totalorder %s134_s19, %s293_s0 }
   0x6   :  { %p140_p2 = pnand %p138_p1, %p135_p0 }
   0x8   :  { %143 = shalt.err (!%p140_p2)
}
   0x9   :  { %s144_s24 = scalar_lea.vmem %s18_s16, 256  ;;  %p149_p4 = scmp.lt.s32.totalorder %s18_s16, %s18_s16 }
   0xa   :  { %p145_p3 = scmp.ne.s32.totalorder %s18_s16, %s144_s24  ;;  %p150_p5 = scmp.lt.s32.totalorder %s144_s24, %s144_s24 }
   0xc   :  { %p151_p6 = por %p150_p5, %p149_p4 }
   0xe   :  { %p152_p7 = pnand %p151_p6, %p145_p3 }
  0x10   :  { %155 = shalt.err (!%p152_p7)
}
  0x11   :  { %s207_s25 = smov 128   ;;  %s208_s26 = smov 8  }
  0x12   :  { %23 = dma.hbm_to_vmem [thread:$0]  %s293_s0, 256, %s18_s16, [#allocation3], %s207_s25, %s207_s25, %s208_s26  }
  0x13   :  { %s209_s29 = smov [#allocation5]   ;;  %s156_s7 = scalar_lea.hbm %s294_s1, 256 }
  0x14   :  { %s29_s30 = sshll.u32 %s209_s29, 4  ;;  %p157_p8 = scmp.ne.s32.totalorder %s294_s1, %s156_s7  ;;  %s30_s30 = int_to_ptr.vmem [resolvable:$true] %s29_s30 }
  0x15   :  { %p160_p9 = scmp.lt.u32.totalorder %s156_s7, %s294_s1 }
  0x17   :  { %p162_p10 = pnand %p160_p9, %p157_p8 }
  0x19   :  { %165 = shalt.err (!%p162_p10)
}
  0x1a   :  { %s166_s12 = scalar_lea.vmem %s30_s30, 256  ;;  %p171_p12 = scmp.lt.s32.totalorder %s30_s30, %s30_s30 }
  0x1b   :  { %p167_p11 = scmp.ne.s32.totalorder %s30_s30, %s166_s12  ;;  %p172_p13 = scmp.lt.s32.totalorder %s166_s12, %s166_s12 }
  0x1d   :  { %p173_p0 = por %p172_p13, %p171_p12 }
  0x1f   :  { %p174_p1 = pnand %p173_p0, %p167_p11 }
  0x21   :  { %177 = shalt.err (!%p174_p1)
}
  0x22   :  { %35 = dma.hbm_to_vmem [thread:$0]  %s294_s1, 256, %s30_s30, [#allocation6], %s207_s25, %s207_s25, %s208_s26  }
  0x23   :  { %200 = dma.done.wait [#allocation3], 256  }
  0x24   :  { %201 = vsyncadd [#allocation3], 4294967040 }
  0x25   :  { %202 = dma.done.wait [#allocation6], 256  }
  0x26   :  { %203 = vsyncadd [#allocation6], 4294967040  ;;  %v46_v0 = vld [vmem:[#allocation5] sm:$0xff]  ;;  %v48_v1 = vld [vmem:[#allocation2] sm:$0xff]  ;;  %vm52_vm0 = vcmask 261120   ;;  %s210_s17 = smov [#allocation7]  }
  0x27   :  { %v47_v2 = vld [vmem:[#allocation5 + $0x8] sm:$0xff]  ;;  %v50_v3 = vadd.f32 %v48_v1, %v46_v0  ;;  %v49_v4 = vld [vmem:[#allocation2 + $0x8] sm:$0xff]  ;;  %v123_v30 = vld [vmem:[%s295_s2] ss:$0 sm:$0xff]  ;;  %s110_s18 = sshll.u32 %s210_s17, 4  ;;  %s111_s18 = int_to_ptr.vmem [resolvable:$true] %s110_s18 }
  0x28   :  { %v51_v5 = vadd.f32 %v49_v4, %v47_v2  ;;  %v124_v32 = vld [vmem:[%s296_s3] ss:$0 sm:$0xff]  ;;  %s178_s2 = scalar_lea.vmem %s111_s18, 256  ;;  %p183_p3 = scmp.lt.s32.totalorder %s111_s18, %s111_s18 }
  0x29   :  { %v53_v6 = vsel %vm52_vm0, %v50_v3, 0.0  ;;  %v59_v7 = vmul.f32 %v50_v3, %v50_v3  ;;  %p179_p2 = scmp.ne.s32.totalorder %s111_s18, %s178_s2  ;;  %p184_p4 = scmp.lt.s32.totalorder %s178_s2, %s178_s2 }
  0x2a   :  { %54 = vadd.xlane.f32.xlu0 %v53_v6  ;;  %v60_v8 = vmul.f32 %v51_v5, %v51_v5  ;;  %v56_v10 = vsel %vm52_vm0, %v51_v5, 0.0 }
  0x2b   :  { %v61_v9 = vsel %vm52_vm0, %v59_v7, 0.0  ;;  %p185_p5 = por %p184_p4, %p183_p3 }
  0x2c   :  { %62 = vadd.xlane.f32.xlu1 %v61_v9  ;;  %v64_v11 = vsel %vm52_vm0, %v60_v8, 0.0 }
  0x2d   :  { %p186_p6 = pnand %p185_p5, %p179_p2 }
  0x2e   :  { %57 = vadd.xlane.f32.xlu0 %v56_v10 }
  0x30   :  { %65 = vadd.xlane.f32.xlu1 %v64_v11 }
  0xb7   :  { %v55_v12 = vpop.xlane.xlu0 %54 }
  0xb8   :  { %v67_v13 = vmul.f32 0.03125, %v55_v12 }
  0xb9   :  { %v63_v14 = vpop.xlane.xlu1 %62 }
  0xba   :  { %v71_v15 = vmul.f32 %v67_v13, %v67_v13  ;;  %v69_v16 = vmul.f32 0.03125, %v63_v14  ;;  %v81_v28 = vsub.f32 %v50_v3, %v67_v13 }
  0xbb   :  { %v58_v17 = vpop.xlane.xlu0 %57 }
  0xbc   :  { %v73_v18 = vsub.f32 %v69_v16, %v71_v15  ;;  %v68_v19 = vmul.f32 0.03125, %v58_v17 }
  0xbd   :  { %v66_v20 = vpop.xlane.xlu1 %65 }
  0xbe   :  { %v75_v21 = vmax.f32 %v73_v18, 0.0  ;;  %v72_v22 = vmul.f32 %v68_v19, %v68_v19  ;;  %v70_v23 = vmul.f32 0.03125, %v66_v20  ;;  %v82_v33 = vsub.f32 %v51_v5, %v68_v19 }
  0xc0   :  { %v77_v24 = vadd.f32 1e-05, %v75_v21  ;;  %v74_v25 = vsub.f32 %v70_v23, %v72_v22 }
  0xc2   :  { %130 = vrsqrt.f32 %v77_v24  ;;  %v76_v26 = vmax.f32 %v74_v25, 0.0 }
  0xc4   :  { %v78_v27 = vadd.f32 1e-05, %v76_v26 }
  0xc6   :  { %132 = vrsqrt.f32 %v78_v27 }
  0xcc   :  { %v131_v29 = vpop.eup %130 }
  0xcd   :  { %v83_v31 = vmul.f32 %v131_v29, %v81_v28 }
  0xcf   :  { %v92_v34 = vmul.f32 %v123_v30, %v83_v31 }
  0xd0   :  { %v133_v35 = vpop.eup %132 }
  0xd1   :  { %v84_v36 = vmul.f32 %v133_v35, %v82_v33  ;;  %v101_v37 = vadd.f32 %v124_v32, %v92_v34 }
  0xd3   :  { %v93_v38 = vmul.f32 %v123_v30, %v84_v36  ;;  %103 = vst.msk [vmem:[#allocation7] sm:$0xff] %vm52_vm0, %v101_v37 }
  0xd5   :  { %v102_v39 = vadd.f32 %v124_v32, %v93_v38 }
  0xd7   :  { %104 = vst.msk [vmem:[#allocation7 + $0x8] sm:$0xff] %vm52_vm0, %v102_v39 }
  0xd8   :  { %189 = shalt.err (!%p186_p6)
}
  0xd9   :  { %s190_s20 = scalar_lea.hbm %s297_s4, 256 }
  0xda   :  { %p191_p7 = scmp.ne.s32.totalorder %s297_s4, %s190_s20  ;;  %p194_p8 = scmp.lt.u32.totalorder %s190_s20, %s297_s4 }
  0xdc   :  { %p196_p9 = pnand %p194_p8, %p191_p7 }
  0xde   :  { %199 = shalt.err (!%p196_p9)
}
  0xdf   :  { %116 = dma.vmem_to_hbm [thread:$0]  %s111_s18, 256, %s297_s4, [#allocation4], %s207_s25, %s207_s25, %s208_s26  }
  0xe0   :  { %204 = dma.done.wait [#allocation4], 256  }
  0xe1   :  { %205 = vsyncadd [#allocation4], 4294967040 }
  0xe2   :  { %120 = vsyncpa [#allocation3], 1 }
  0xe3   :  { %121 = vsyncpa [#allocation6], 1 }
  0xe4   :  { %122 = vsyncpa [#allocation4], 1 }

</bundles_post_ra>
